<compile_context>
chip_gen: v6e
topology: v6e:2x2x1
jax: 0.10.0
libtpu: 0.0.40
codegen_flags: <defaults>
</compile_context>

<pallas_src>
import functools

import jax
import jax.numpy as jnp
from jax import lax
from jax.experimental import pallas as pl
from jax.experimental.pallas import tpu as pltpu

EPS = 1e-3                    # LayerNormalization eps (added to std, not variance)
NEG_MASK = -1e30              # finite "-inf" for masked_fill (avoids NaN rows)
MATMUL_DTYPE = jnp.bfloat16   # MXU input dtype; accumulation stays f32
ATTN_OUT_DTYPE = jnp.bfloat16 # attention-weight writeback dtype (perf)


def _pick_tile(n, preferred, granule=8):
    """Largest multiple of `granule` that divides n and is <= preferred, else n."""
    if n <= preferred or n % granule != 0:
        return n
    t = (preferred // granule) * granule
    while t >= granule:
        if n % t == 0:
            return t
        t -= granule
    return n


def _vmem_limit_bytes():
    # Raise the scoped-VMEM limit toward physical capacity with headroom
    # (128 MiB v5e/v6e, 64 MiB v7x).  Falls back to compiler default.
    try:
        return int(pltpu.get_tpu_info().vmem_capacity_bytes) * 3 // 4
    except Exception:
        return None


def _compiler_params(dims, vmem_limit):
    kwargs = dict(dimension_semantics=dims)
    if vmem_limit:
        kwargs["vmem_limit_bytes"] = vmem_limit
    return pltpu.CompilerParams(**kwargs)


def _custom_layer_norm(z, a, b):
    """Matches the PyTorch LayerNormalization module:
    mu = mean(z, -1); sigma = unbiased std (divide by N-1);
    out = (z - mu) / (sigma + eps) * a + b.   All math in f32, exact divide."""
    d = z.shape[-1]
    mu = jnp.mean(z, axis=-1, keepdims=True)
    var = jnp.sum((z - mu) ** 2, axis=-1, keepdims=True) * (1.0 / (d - 1))
    sigma = jnp.sqrt(var)
    return (z - mu) / (sigma + EPS) * a + b


# --------------------------- kernel 1: Q/K/V projection ----------------------
def _qkv_kernel(x_ref, wq_ref, wk_ref, wv_ref, q_ref, k_ref, v_ref):
    """One (batch, head) step: head-major Q/K/V projections, bf16 out."""
    x = x_ref[0]                                                  # (L, D) bf16
    q_ref[0, 0] = jnp.dot(x, wq_ref[0],
                          preferred_element_type=jnp.float32).astype(q_ref.dtype)
    k_ref[0, 0] = jnp.dot(x, wk_ref[0],
                          preferred_element_type=jnp.float32).astype(k_ref.dtype)
    v_ref[0, 0] = jnp.dot(x, wv_ref[0],
                          preferred_element_type=jnp.float32).astype(v_ref.dtype)


# -------------- kernel 2: attention + output proj + residual + LN1 -----------
def _attn_proj_ln_kernel(q_ref, k_ref, v_ref, bias_ref, resid_ref, wp_ref,
                         bp_ref, a1_ref, b1_ref, *out_refs, n_head, with_attn):
    """One (batch, q-tile) step.  All head slicing is along leading ref dims
    (free views, lane offset 0).  Heads never hit HBM: each head output is
    projected and accumulated into the (TQ, D) f32 `acc`."""
    if with_attn:
        attn_ref, x1_ref = out_refs
    else:
        (x1_ref,) = out_refs

    tq = q_ref.shape[2]
    d_model = wp_ref.shape[-1]
    bias = bias_ref[0].astype(jnp.float32)        # (TQ, L) additive mask bias

    acc = jnp.zeros((tq, d_model), jnp.float32)
    for h in range(n_head):                        # static unroll over heads
        q_h = q_ref[0, h]                          # (TQ, dk) bf16
        k_h = k_ref[0, h]                          # (L,  dk) bf16
        v_h = v_ref[0, h]                          # (L,  dv) bf16
        # (TQ, dk) . (L, dk)^T -> (TQ, L); 1/temper is pre-folded into w_qs.
        s = lax.dot_general(q_h, k_h, (((1,), (1,)), ((), ())),
                            preferred_element_type=jnp.float32)
        s = s + bias                               # masked_fill via additive bias
        m = jnp.max(s, axis=-1, keepdims=True)
        e = jnp.exp(s - m)
        p = e * pl.reciprocal(jnp.sum(e, axis=-1, keepdims=True), approx=True)
        # TODO(synk): attention dropout omitted (eval-mode forward).
        if with_attn:
            attn_ref[h, 0] = p.astype(attn_ref.dtype)
        o_h = jnp.dot(p.astype(MATMUL_DTYPE), v_h,
                      preferred_element_type=jnp.float32)          # (TQ, dv)
        acc = acc + jnp.dot(o_h.astype(MATMUL_DTYPE), wp_ref[h],
                            preferred_element_type=jnp.float32)    # proj accumulate
    # projection bias + residual + LayerNormalization (MHA output, f32)
    x1_ref[0] = _custom_layer_norm(acc + bp_ref[...] + resid_ref[0],
                                   a1_ref[...], b1_ref[...])


# ------------- kernel 3: position-wise FFN + residual + LN2 ------------------
def _ffn_kernel(x1_ref, w1_ref, c1_ref, w2_ref, c2_ref, a2_ref, b2_ref,
                out_ref, acc_ref):
    """Grid (batch, seq-tile, d_inner-chunk); chunk axis is a reduction."""
    c = pl.program_id(2)

    @pl.when(c == 0)
    def _():
        acc_ref[...] = jnp.zeros_like(acc_ref)

    x1 = x1_ref[0]                                                 # (TL, D) f32
    h = jnp.maximum(
        jnp.dot(x1.astype(MATMUL_DTYPE), w1_ref[...],
                preferred_element_type=jnp.float32) + c1_ref[...], 0.0)
    acc_ref[...] += jnp.dot(h.astype(MATMUL_DTYPE), w2_ref[...],
                            preferred_element_type=jnp.float32)
    # TODO(synk): ffn dropout omitted (eval-mode forward).

    @pl.when(c == pl.num_programs(2) - 1)
    def _():
        out_ref[0] = _custom_layer_norm(acc_ref[...] + c2_ref[...] + x1,
                                        a2_ref[...], b2_ref[...])


def encoder_layer(x, mask, params, *, return_attn=True):
    """x: (B, L, D) float32.  mask: (B, L, L) float32 (nonzero = masked).
    Returns (enc_output (B, L, D) f32, attns (n_head*B, L, L) bf16 or None)."""
    B, L, D = x.shape
    H, _, dk = params["w_qs"].shape
    dv = params["w_vs"].shape[-1]
    d_inner = params["w1"].shape[-1]
    temper = float(D) ** 0.5
    vmem_limit = _vmem_limit_bytes()

    # Weights stay head-major (H, D, d) so per-head slices in-kernel are free
    # leading-dim views; fold 1/temper into w_qs; bf16 MXU inputs.
    wq = (params["w_qs"] / temper).astype(MATMUL_DTYPE)            # (H, D, dk)
    wk = params["w_ks"].astype(MATMUL_DTYPE)                       # (H, D, dk)
    wv = params["w_vs"].astype(MATMUL_DTYPE)                       # (H, D, dv)
    wp = params["w_proj"].reshape(H, dv, D).astype(MATMUL_DTYPE)   # head-major proj
    w1 = params["w1"].astype(MATMUL_DTYPE)
    w2 = params["w2"].astype(MATMUL_DTYPE)

    x_bf16 = x.astype(MATMUL_DTYPE)   # matmul copy; f32 x only read as residual
    # Precomputed additive mask bias (replaces per-head cmp+select in-kernel).
    bias = jnp.where(mask > 0, NEG_MASK, 0.0).astype(MATMUL_DTYPE)

    # ---------------- kernel 1: Q/K/V projections, grid (batch, head) --------
    qkv_fn = pl.pallas_call(
        _qkv_kernel,
        out_shape=(jax.ShapeDtypeStruct((B, H, L, dk), MATMUL_DTYPE),
                   jax.ShapeDtypeStruct((B, H, L, dk), MATMUL_DTYPE),
                   jax.ShapeDtypeStruct((B, H, L, dv), MATMUL_DTYPE)),
        grid_spec=pltpu.PrefetchScalarGridSpec(
            num_scalar_prefetch=0,
            grid=(B, H),
            in_specs=[
                # x resident across heads (DMA'd once per batch row).
                pl.BlockSpec((1, L, D), lambda b, h: (b, 0, 0)),
                pl.BlockSpec((1, D, dk), lambda b, h: (h, 0, 0)),   # w_qs (scaled)
                pl.BlockSpec((1, D, dk), lambda b, h: (h, 0, 0)),   # w_ks
                pl.BlockSpec((1, D, dv), lambda b, h: (h, 0, 0)),   # w_vs
            ],
            out_specs=[
                pl.BlockSpec((1, 1, L, dk), lambda b, h: (b, h, 0, 0)),
                pl.BlockSpec((1, 1, L, dk), lambda b, h: (b, h, 0, 0)),
                pl.BlockSpec((1, 1, L, dv), lambda b, h: (b, h, 0, 0)),
            ]),
        compiler_params=_compiler_params(("parallel", "parallel"), vmem_limit),
    )
    q, k, v = qkv_fn(x_bf16, wq, wk, wv)

    # ------- kernel 2: attention + proj + residual + LN1, grid (B, L//TQ) ----
    TQ = _pick_tile(L, 256)
    n_q = L // TQ
    x1_sds = jax.ShapeDtypeStruct((B, L, D), jnp.float32)
    x1_spec = pl.BlockSpec((1, TQ, D), lambda b, qi: (b, qi, 0))
    if return_attn:
        out_shape = (jax.ShapeDtypeStruct((H, B, L, L), ATTN_OUT_DTYPE), x1_sds)
        out_specs = [pl.BlockSpec((H, 1, TQ, L), lambda b, qi: (0, b, qi, 0)),
                     x1_spec]
    else:
        out_shape = x1_sds
        out_specs = x1_spec

    attn_fn = pl.pallas_call(
        functools.partial(_attn_proj_ln_kernel, n_head=H, with_attn=return_attn),
        out_shape=out_shape,
        grid_spec=pltpu.PrefetchScalarGridSpec(
            num_scalar_prefetch=0,
            grid=(B, n_q),
            in_specs=[
                pl.BlockSpec((1, H, TQ, dk), lambda b, qi: (b, 0, qi, 0)),  # Q tile
                pl.BlockSpec((1, H, L, dk), lambda b, qi: (b, 0, 0, 0)),    # K (resident per b)
                pl.BlockSpec((1, H, L, dv), lambda b, qi: (b, 0, 0, 0)),    # V (resident per b)
                pl.BlockSpec((1, TQ, L), lambda b, qi: (b, qi, 0)),         # mask bias (bf16)
                pl.BlockSpec((1, TQ, D), lambda b, qi: (b, qi, 0)),         # residual (f32 x)
                pl.BlockSpec((H, dv, D), lambda b, qi: (0, 0, 0)),          # proj W head-major
                pl.BlockSpec((1, D), lambda b, qi: (0, 0)),                 # proj bias
                pl.BlockSpec((1, D), lambda b, qi: (0, 0)),                 # ln1 a_2
                pl.BlockSpec((1, D), lambda b, qi: (0, 0)),                 # ln1 b_2
            ],
            out_specs=out_specs),
        compiler_params=_compiler_params(("parallel", "parallel"), vmem_limit),
    )
    if return_attn:
        attn_hb, x1 = attn_fn(q, k, v, bias, x, wp, params["b_proj"],
                              params["ln1_a"], params["ln1_b"])
        attns = attn_hb.reshape(H * B, L, L)   # free reshape; torch ordering
    else:
        x1 = attn_fn(q, k, v, bias, x, wp, params["b_proj"],
                     params["ln1_a"], params["ln1_b"])
        attns = None
    # TODO(synk): for very long L with return_attn=False, a flash-style
    # K-streaming (online softmax) variant would avoid the (TQ, L) scores.

    # ---- kernel 3: FFN + residual + LN2, grid (B, L//TL, d_inner//C) --------
    TL = _pick_tile(L, 512)
    n_t = L // TL
    CI = _pick_tile(d_inner, 512, granule=128)   # lane-aligned d_inner chunks
    n_c = d_inner // CI
    ffn_fn = pl.pallas_call(
        _ffn_kernel,
        out_shape=jax.ShapeDtypeStruct((B, L, D), jnp.float32),
        grid_spec=pltpu.PrefetchScalarGridSpec(
            num_scalar_prefetch=0,
            grid=(B, n_t, n_c),
            in_specs=[
                pl.BlockSpec((1, TL, D), lambda b, t, c: (b, t, 0)),  # x1 (resident over c)
                pl.BlockSpec((D, CI), lambda b, t, c: (0, c)),        # w_1 chunk (bf16)
                pl.BlockSpec((1, CI), lambda b, t, c: (0, c)),        # b_1 chunk
                pl.BlockSpec((CI, D), lambda b, t, c: (c, 0)),        # w_2 chunk (bf16)
                pl.BlockSpec((1, D), lambda b, t, c: (0, 0)),         # b_2
                pl.BlockSpec((1, D), lambda b, t, c: (0, 0)),         # ln2 a_2
                pl.BlockSpec((1, D), lambda b, t, c: (0, 0)),         # ln2 b_2
            ],
            out_specs=pl.BlockSpec((1, TL, D), lambda b, t, c: (b, t, 0)),
            scratch_shapes=[pltpu.VMEM((TL, D), jnp.float32)]),
        compiler_params=_compiler_params(
            ("parallel", "parallel", "arbitrary"), vmem_limit),
    )
    enc_out = ffn_fn(x1, w1, params["b1"], w2, params["b2"],
                     params["ln2_a"], params["ln2_b"])
    return enc_out, attns


def init_params(key, d_model, d_inner, n_head, d_k, d_v):
    ks = jax.random.split(key, 6)

    def xavier(k, shape, fan_in, fan_out):
        std = (2.0 / (fan_in + fan_out)) ** 0.5
        return (std * jax.random.normal(k, shape)).astype(jnp.float32)

    return dict(
        w_qs=xavier(ks[0], (n_head, d_model, d_k), d_model, d_k),
        w_ks=xavier(ks[1], (n_head, d_model, d_k), d_model, d_k),
        w_vs=xavier(ks[2], (n_head, d_model, d_v), d_model, d_v),
        w_proj=xavier(ks[3], (n_head * d_v, d_model), n_head * d_v, d_model),
        b_proj=jnp.zeros((1, d_model), jnp.float32),
        ln1_a=jnp.ones((1, d_model), jnp.float32),
        ln1_b=jnp.zeros((1, d_model), jnp.float32),
        w1=xavier(ks[4], (d_model, d_inner), d_model, d_inner),  # conv1d k=1 (transposed)
        b1=jnp.zeros((1, d_inner), jnp.float32),
        w2=xavier(ks[5], (d_inner, d_model), d_inner, d_model),  # conv1d k=1 (transposed)
        b2=jnp.zeros((1, d_model), jnp.float32),
        ln2_a=jnp.ones((1, d_model), jnp.float32),
        ln2_b=jnp.zeros((1, d_model), jnp.float32),
    )


def _reference(x, mask, params):
    """Pure-JAX f32 reference (PyTorch eval-mode semantics)."""
    B, L, D = x.shape
    H = params["w_qs"].shape[0]
    dv = params["w_vs"].shape[-1]
    temper = float(D) ** 0.5

    def ln(z, a, b):
        d = z.shape[-1]
        mu = jnp.mean(z, -1, keepdims=True)
        sigma = jnp.sqrt(jnp.sum((z - mu) ** 2, -1, keepdims=True) / (d - 1))
        return (z - mu) / (sigma + EPS) * a + b

    qs = jnp.einsum("bld,hdk->hblk", x, params["w_qs"], precision="highest")
    ks = jnp.einsum("bld,hdk->hblk", x, params["w_ks"], precision="highest")
    vs = jnp.einsum("bld,hdk->hblk", x, params["w_vs"], precision="highest")
    sc = jnp.einsum("hbqk,hbmk->hbqm", qs, ks, precision="highest") / temper
    sc = jnp.where(mask[None] > 0, NEG_MASK, sc)
    p = jax.nn.softmax(sc, axis=-1)
    out = jnp.einsum("hbqm,hbmv->hbqv", p, vs, precision="highest")
    heads = jnp.transpose(out, (1, 2, 0, 3)).reshape(B, L, H * dv)
    proj = heads @ params["w_proj"] + params["b_proj"]
    x1 = ln(proj + x, params["ln1_a"], params["ln1_b"])
    h = jnp.maximum(x1 @ params["w1"] + params["b1"], 0.0)
    o = h @ params["w2"] + params["b2"]
    return ln(o + x1, params["ln2_a"], params["ln2_b"]), p.reshape(H * B, L, L)


if __name__ == "__main__":
    B, L = 2, 8
    d_model, d_inner, n_head, d_k, d_v = 32, 64, 2, 16, 16

    key = jax.random.PRNGKey(0)
    k_x, k_p = jax.random.split(key)
    x = jax.random.normal(k_x, (B, L, d_model), dtype=jnp.float32)
    mask = jnp.zeros((B, L, L), dtype=jnp.float32)  # no positions masked
    params = init_params(k_p, d_model, d_inner, n_head, d_k, d_v)

    enc_out, attns = encoder_layer(x, mask, params, return_attn=True)
    jax.block_until_ready((enc_out, attns))

    # Tolerance accounts for bf16 matmul inputs (f32 accumulate) and bf16 attn
    # writeback vs. the f32 reference.
    ref_out, ref_attn = _reference(x, mask, params)
    assert jnp.allclose(enc_out, ref_out, atol=3e-2, rtol=3e-2), "enc_output mismatch"
    assert jnp.allclose(attns.astype(jnp.float32), ref_attn,
                        atol=3e-2, rtol=3e-2), "attn mismatch"

    print("KERNEL_OK")
</pallas_src>

<mosaic_0001>
module attributes {stable_mosaic.version = 11 : i64} {
  func.func @_qkv_kernel(%arg0: i32, %arg1: i32, %arg2: memref<1x8x32xbf16, #tpu.memory_space<vmem>>, %arg3: memref<1x32x16xbf16, #tpu.memory_space<vmem>>, %arg4: memref<1x32x16xbf16, #tpu.memory_space<vmem>>, %arg5: memref<1x32x16xbf16, #tpu.memory_space<vmem>>, %arg6: memref<1x1x8x16xbf16, #tpu.memory_space<vmem>>, %arg7: memref<1x1x8x16xbf16, #tpu.memory_space<vmem>>, %arg8: memref<1x1x8x16xbf16, #tpu.memory_space<vmem>>) attributes {dimension_semantics = [#tpu.dimension_semantics<parallel>, #tpu.dimension_semantics<parallel>], iteration_bounds = array<i64: 2, 2>, scalar_prefetch = 0 : i64, scratch_operands = 0 : i64, tpu.core_type = #tpu.core_type<tc>, window_params = [{transform_indices = @transform_0, window_bounds = array<i64: 1, 8, 32>}, {transform_indices = @transform_1, window_bounds = array<i64: 1, 32, 16>}, {transform_indices = @transform_2, window_bounds = array<i64: 1, 32, 16>}, {transform_indices = @transform_3, window_bounds = array<i64: 1, 32, 16>}, {transform_indices = @transform_4, window_bounds = array<i64: 1, 1, 8, 16>}, {transform_indices = @transform_5, window_bounds = array<i64: 1, 1, 8, 16>}, {transform_indices = @transform_6, window_bounds = array<i64: 1, 1, 8, 16>}]} {
    %c0 = arith.constant 0 : index
    %c0_0 = arith.constant 0 : index
    %c0_1 = arith.constant 0 : index
    %0 = vector.load %arg2[%c0, %c0_0, %c0_1] : memref<1x8x32xbf16, #tpu.memory_space<vmem>>, vector<1x8x32xbf16>
    %1 = vector.shape_cast %0 : vector<1x8x32xbf16> to vector<8x32xbf16>
    %c0_2 = arith.constant 0 : index
    %c0_3 = arith.constant 0 : index
    %c0_4 = arith.constant 0 : index
    %2 = vector.load %arg3[%c0_2, %c0_3, %c0_4] : memref<1x32x16xbf16, #tpu.memory_space<vmem>>, vector<1x32x16xbf16>
    %3 = vector.shape_cast %2 : vector<1x32x16xbf16> to vector<32x16xbf16>
    %cst = arith.constant dense<0.000000e+00> : vector<8x16xf32>
    %4 = tpu.matmul %1, %3, %cst {dimension_numbers = #tpu.dot_dimension_numbers<[1], [0], [0], [1], [0, 0, 1, 1], [], []>} : vector<8x32xbf16>, vector<32x16xbf16>, vector<8x16xf32> -> vector<8x16xf32>
    %5 = arith.truncf %4 : vector<8x16xf32> to vector<8x16xbf16>
    %c0_5 = arith.constant 0 : index
    %c0_6 = arith.constant 0 : index
    %c0_7 = arith.constant 0 : index
    %c0_8 = arith.constant 0 : index
    %6 = vector.load %arg6[%c0_5, %c0_6, %c0_7, %c0_8] : memref<1x1x8x16xbf16, #tpu.memory_space<vmem>>, vector<1x1x8x16xbf16>
    %7 = vector.shape_cast %6 : vector<1x1x8x16xbf16> to vector<8x16xbf16>
    %8 = vector.shape_cast %5 : vector<8x16xbf16> to vector<1x1x8x16xbf16>
    tpu.vector_store %arg6[%c0_5, %c0_6, %c0_7, %c0_8], %8 {strides = array<i32>} : memref<1x1x8x16xbf16, #tpu.memory_space<vmem>>, vector<1x1x8x16xbf16>,
    %c0_9 = arith.constant 0 : index
    %c0_10 = arith.constant 0 : index
    %c0_11 = arith.constant 0 : index
    %9 = vector.load %arg4[%c0_9, %c0_10, %c0_11] : memref<1x32x16xbf16, #tpu.memory_space<vmem>>, vector<1x32x16xbf16>
    %10 = vector.shape_cast %9 : vector<1x32x16xbf16> to vector<32x16xbf16>
    %cst_12 = arith.constant dense<0.000000e+00> : vector<8x16xf32>
    %11 = tpu.matmul %1, %10, %cst_12 {dimension_numbers = #tpu.dot_dimension_numbers<[1], [0], [0], [1], [0, 0, 1, 1], [], []>} : vector<8x32xbf16>, vector<32x16xbf16>, vector<8x16xf32> -> vector<8x16xf32>
    %12 = arith.truncf %11 : vector<8x16xf32> to vector<8x16xbf16>
    %c0_13 = arith.constant 0 : index
    %c0_14 = arith.constant 0 : index
    %c0_15 = arith.constant 0 : index
    %c0_16 = arith.constant 0 : index
    %13 = vector.load %arg7[%c0_13, %c0_14, %c0_15, %c0_16] : memref<1x1x8x16xbf16, #tpu.memory_space<vmem>>, vector<1x1x8x16xbf16>
    %14 = vector.shape_cast %13 : vector<1x1x8x16xbf16> to vector<8x16xbf16>
    %15 = vector.shape_cast %12 : vector<8x16xbf16> to vector<1x1x8x16xbf16>
    tpu.vector_store %arg7[%c0_13, %c0_14, %c0_15, %c0_16], %15 {strides = array<i32>} : memref<1x1x8x16xbf16, #tpu.memory_space<vmem>>, vector<1x1x8x16xbf16>,
    %c0_17 = arith.constant 0 : index
    %c0_18 = arith.constant 0 : index
    %c0_19 = arith.constant 0 : index
    %16 = vector.load %arg5[%c0_17, %c0_18, %c0_19] : memref<1x32x16xbf16, #tpu.memory_space<vmem>>, vector<1x32x16xbf16>
    %17 = vector.shape_cast %16 : vector<1x32x16xbf16> to vector<32x16xbf16>
    %cst_20 = arith.constant dense<0.000000e+00> : vector<8x16xf32>
    %18 = tpu.matmul %1, %17, %cst_20 {dimension_numbers = #tpu.dot_dimension_numbers<[1], [0], [0], [1], [0, 0, 1, 1], [], []>} : vector<8x32xbf16>, vector<32x16xbf16>, vector<8x16xf32> -> vector<8x16xf32>
    %19 = arith.truncf %18 : vector<8x16xf32> to vector<8x16xbf16>
    %c0_21 = arith.constant 0 : index
    %c0_22 = arith.constant 0 : index
    %c0_23 = arith.constant 0 : index
    %c0_24 = arith.constant 0 : index
    %20 = vector.load %arg8[%c0_21, %c0_22, %c0_23, %c0_24] : memref<1x1x8x16xbf16, #tpu.memory_space<vmem>>, vector<1x1x8x16xbf16>
    %21 = vector.shape_cast %20 : vector<1x1x8x16xbf16> to vector<8x16xbf16>
    %22 = vector.shape_cast %19 : vector<8x16xbf16> to vector<1x1x8x16xbf16>
    tpu.vector_store %arg8[%c0_21, %c0_22, %c0_23, %c0_24], %22 {strides = array<i32>} : memref<1x1x8x16xbf16, #tpu.memory_space<vmem>>, vector<1x1x8x16xbf16>,
    return
  }
  func.func @transform_0(%arg0: i32, %arg1: i32) -> (i32, i32, i32) {
    %c0_i32 = arith.constant 0 : i32
    %c0_i32_0 = arith.constant 0 : i32
    %c0_i32_1 = arith.constant 0 : i32
    return %arg0, %c0_i32, %c0_i32_0 : i32, i32, i32
  }
  func.func @transform_1(%arg0: i32, %arg1: i32) -> (i32, i32, i32) {
    %c0_i32 = arith.constant 0 : i32
    %c0_i32_0 = arith.constant 0 : i32
    %c0_i32_1 = arith.constant 0 : i32
    return %arg1, %c0_i32, %c0_i32_0 : i32, i32, i32
  }
  func.func @transform_2(%arg0: i32, %arg1: i32) -> (i32, i32, i32) {
    %c0_i32 = arith.constant 0 : i32
    %c0_i32_0 = arith.constant 0 : i32
    %c0_i32_1 = arith.constant 0 : i32
    return %arg1, %c0_i32, %c0_i32_0 : i32, i32, i32
  }
  func.func @transform_3(%arg0: i32, %arg1: i32) -> (i32, i32, i32) {
    %c0_i32 = arith.constant 0 : i32
    %c0_i32_0 = arith.constant 0 : i32
    %c0_i32_1 = arith.constant 0 : i32
    return %arg1, %c0_i32, %c0_i32_0 : i32, i32, i32
  }
  func.func @transform_4(%arg0: i32, %arg1: i32) -> (i32, i32, i32, i32) {
    %c0_i32 = arith.constant 0 : i32
    %c0_i32_0 = arith.constant 0 : i32
    %c0_i32_1 = arith.constant 0 : i32
    return %arg0, %arg1, %c0_i32, %c0_i32_0 : i32, i32, i32, i32
  }
  func.func @transform_5(%arg0: i32, %arg1: i32) -> (i32, i32, i32, i32) {
    %c0_i32 = arith.constant 0 : i32
    %c0_i32_0 = arith.constant 0 : i32
    %c0_i32_1 = arith.constant 0 : i32
    return %arg0, %arg1, %c0_i32, %c0_i32_0 : i32, i32, i32, i32
  }
  func.func @transform_6(%arg0: i32, %arg1: i32) -> (i32, i32, i32, i32) {
    %c0_i32 = arith.constant 0 : i32
    %c0_i32_0 = arith.constant 0 : i32
    %c0_i32_1 = arith.constant 0 : i32
    return %arg0, %arg1, %c0_i32, %c0_i32_0 : i32, i32, i32, i32
  }
}

</mosaic_0001>

<bundles_post_ra>
// kernel: tpu_custom_call.1
= control target key start
LH: loop header
LB: loop body
LE: loop exit
PB: predicated region body
PF: predicated region fallthrough
CT: control target
= control target key end

     0   :  { %s1327_s0 = inlined_call_operand.vmem [shape: bf16[2,8,32], index: 0, kind: input, shape index: {}]   ;;  %s1328_s1 = inlined_call_operand.vmem [shape: bf16[2,32,16], index: 1, kind: input, shape index: {}]   ;;  %s1329_s2 = inlined_call_operand.vmem [shape: bf16[2,32,16], index: 2, kind: input, shape index: {}]   ;;  %s1330_s3 = inlined_call_operand.vmem [shape: bf16[2,32,16], index: 3, kind: input, shape index: {}]   ;;  %s1331_s4 = inlined_call_operand.hbm [shape: bf16[2,2,8,16], index: 4, kind: output, shape index: {0}]   ;;  %s1332_s5 = inlined_call_operand.hbm [shape: bf16[2,2,8,16], index: 5, kind: output, shape index: {1}]   ;;  %s1333_s6 = inlined_call_operand.hbm [shape: bf16[2,2,8,16], index: 6, kind: output, shape index: {2}]  }
   0x1   :  { %1339 = sst [smem:[#allocation12_spill]] %s1327_s0 }
   0x2   :  { %12 = vsyncpa [#allocation3], 0 }
   0x3   :  { %14 = vsyncpa [#allocation3 + $0x1], 0 }
   0x4   :  { %15 = vsyncpa [#allocation5], 0 }
   0x5   :  { %17 = vsyncpa [#allocation5 + $0x1], 0  ;;  %s1103_s21 = smov 0   ;;  %s1105_s22 = smov 0  }
   0x6   :  { %s1107_s23 = smov 0   ;;  %s1109_s24 = smov 0  }
   0x7   :  { %s1111_s25 = smov 0   ;;  %s1113_s26 = smov 0  }
   0x8   :  { %s1115_s27 = smov 0   ;;  %s1117_s28 = smov 0  }
   0x9 LB: > { %1340 = sst [smem:[#allocation9_spill]] %s1057_s27  ;;  %s1335_s29 = sadd.s32 4294967295, %s1061_s28   ;;  %s1061_s28 = sphi %s1117_s28, %s23_s28   ;;  %s1057_s27 = sphi %s1115_s27, %s1350_s27   ;;  %s1053_s26 = sphi %s1113_s26, %s1355_s26   ;;  %s1049_s25 = sphi %s1111_s25, %s1348_s25   ;;  %s1045_s24 = sphi %s1109_s24, %s1354_s24   ;;  %s1041_s23 = sphi %s1107_s23, %s1353_s23   ;;  %s1037_s22 = sphi %s1105_s22, %s1352_s22   ;;  %s1033_s21 = sphi %s1103_s21, %s1351_s21  }
   0xa   : > { %s1334_s30 = sadd.s32 4294967294, %s1061_s28   ;;  %s32_s7 = sadd.s32 1, %s1053_s26 }
   0xb   : > { %p33_p0 = scmp.ge.s32.totalorder %s32_s7, 2  ;;  %s35_s8 = sadd.s32 1, %s1057_s27 }
   0xc   : > { %p158_p1 = scmp.ne.s32.totalorder %s1041_s23, %s1037_s22  ;;  %p159_p2 = scmp.eq.s32.totalorder %s1335_s29, 3 }
   0xd   : > { %s1357_s7 = smov (%p33_p0, %s32_s7), 0  ;;  %s1359_s8 = smov (!%p33_p0, %s35_s8), %s1057_s27 }
   0xe   : > { %1341 = sst [smem:[#allocation10_spill]] %s1357_s7  ;;  %s144_s9 = ssub.s32 %s1053_s26, %s1357_s7 }
   0xf   : > { %p1156_p3 = por %p159_p2, %p158_p1  ;;  %p37_p4 = scmp.ge.s32.totalorder %s1359_s8, 2 }
  0x10   : > { %p164_p5 = scmp.ne.s32.totalorder %s1037_s22, %s1033_s21  ;;  %p165_p6 = scmp.eq.s32.totalorder %s1334_s30, 3 }
  0x11   : > { %p757_p7 = scmp.ge.s32.totalorder %s1061_s28, 1  ;;  %s1361_s8 = smov (%p37_p4, %s1359_s8), 0 }
  0x12   : > { %1343 = sst [smem:[#allocation11_spill]] %s1361_s8  ;;  %p1167_p8 = por %p165_p6, %p164_p5 }
  0x13   : > { %p270_p9 = scmp.lt.s32.totalorder %s1061_s28, 5  ;;  %s143_s12 = ssub.s32 %s1057_s27, %s1361_s8 }
  0x14   : > { %s148_s13 = sadd.s32 1, %s1041_s23  ;;  %s145_s14 = sor.u32 %s144_s9, %s143_s12 }
  0x15   : > { %p271_p10 = pnand %p757_p7, %p270_p9  ;;  %p146_p11 = scmp.eq.s32.totalorder %s145_s14, 0 }
  0x16   : > { %p328_p12 = scmp.lt.s32.totalorder (!%p271_p10), %s1045_s24, 1  ;;  %p324_p13 = scmp.lt.s32.totalorder (!%p271_p10), %s1049_s25, 1 }
  0x17   : > { %s1176_s15 = scalar_select %p146_p11, %s1041_s23, %s148_s13  }
  0x18   : > { %274 = sbr.rel (%p271_p10) target bundleno = 295 (0x127), region = 36  ;;  %s1345_s0 = sld [smem:[#allocation12_spill]] (!%p271_p10) }
  0x19   : > { %s307_s27 = sand.u32 (!%p271_p10), 1, %s1037_s22   ;;  %s780_s29 = sshll.u32 (!%p271_p10), %s1049_s25, 1 }
  0x1a   : > { %s546_s8 = sadd.s32 (!%p271_p10), %s1045_s24, %s780_s29 }
  0x1b   : > { %s1206_s20 = sshll.u32 (!%p271_p10), %s546_s8, 6  ;;  %s525_s8 = scalar_lea.sflag (!%p271_p10), [#allocation3], %s307_s27 }
  0x1c   : > { %s1222_s29 = scalar_lea.hbm (!%p271_p10), %s1332_s5, %s1206_s20 }
  0x1d   : > { %v1063_v0 = vmov 0.0   ;;  %s329_s16 = scalar_select %p328_p12, %s1045_s24, 1  ;;  %vm1064_vm0 = vmmov 0   ;;  %vm361_vm1 = vcmask 261120   ;;  %vm406_vm2 = vcmask 125952  }
  0x1e   : > { %800 = vmatprep.subr.bf16.mxu0 %v1063_v0  ;;  %808 = vmatprep.subr.bf16.mxu1 %v1063_v0  ;;  %s325_s17 = scalar_select %p324_p13, %s1049_s25, 1 }
  0x1f   : > { %804 = vmatprep.mubr.msk.bf16.mxu0 %vm1064_vm0, %v1063_v0  ;;  %812 = vmatprep.mubr.msk.bf16.mxu1 %vm1064_vm0, %v1063_v0  ;;  %s788_s18 = sshll.u32 %s329_s16, 4  ;;  %s1214_s24 = scalar_lea.hbm %s1331_s4, %s1206_s20 }
  0x20   : > { %s332_s9 = scalar_lea.vmem %s1328_s1, %s788_s18  ;;  %s337_s14 = scalar_lea.vmem %s1329_s2, %s788_s18 }
  0x21   : > { %v907_v1 = vld [vmem:[%s332_s9 + $0x8] sm:$0xff]   ;;  %s761_s30 = sshll.u32 %s325_s17, 2  ;;  %v909_v3 = vld [vmem:[%s332_s9] sm:$0xff]   ;;  %s342_s7 = scalar_lea.vmem %s1330_s3, %s788_s18 }
  0x22   : > { %v908_v2 = vld [vmem:[%s337_s14 + $0x8] sm:$0xff]   ;;  %801 = vmatpush3.bf16.msra.mxu0 %v907_v1  ;;  %s327_s19 = scalar_lea.vmem %s1345_s0, %s761_s30  ;;  %v910_v4 = vld [vmem:[%s337_s14] sm:$0xff]   ;;  %s1199_s30 = sshll.u32 %s307_s27, 2 }
  0x23   : > { %802 = vmatprep.subr.bf16.mxu0 %v1063_v0  ;;  %809 = vmatpush3.bf16.msra.mxu1 %v908_v2  ;;  %v344_v5 = vld [vmem:[%s327_s19] sm:$0xf]  ;;  %v911_v6 = vld [vmem:[%s342_s7 + $0x8] sm:$0xff]   ;;  %s1346_s17 = sadd.s32 4294967295, %s1061_s28   ;;  %s316_s12 = scalar_lea.vmem [#allocation4], %s1199_s30 }
  0x24   : > { %810 = vmatprep.subr.bf16.mxu1 %v1063_v0  ;;  %v912_v7 = vld [vmem:[%s342_s7] sm:$0xff]   ;;  %s1204_s18 = sand.u32 1, %s1346_s17   ;;  %s309_s7 = scalar_lea.vmem [#allocation2], %s1199_s30 }
  0x25   : > { %s550_s9 = sshll.u32 %s309_s7, 4  ;;  %s565_s13 = sshll.u32 %s316_s12, 4  ;;  %s1216_s9 = int_to_ptr.vmem [resolvable:$true] %s550_s9  ;;  %s1224_s13 = int_to_ptr.vmem [resolvable:$true] %s565_s13 }
  0x26   : > { %803 = vmatpush3.bf16.msra.mxu0 %v909_v3  ;;  %s913_s17 = scalar_lea.vmem %s1216_s9, 64  ;;  %s1065_s25 = smov [#allocation2]  }
  0x27   : > { %811 = vmatpush3.bf16.msra.mxu1 %v910_v4  ;;  %816 = vmatprep.subr.bf16.mxu0 %v1063_v0  ;;  %p914_p0 = scmp.ne.s32.totalorder %s1216_s9, %s913_s17  ;;  %s917_s14 = sshll.u32 %s1065_s25, 4  ;;  %s918_s14 = int_to_ptr.vmem [resolvable:$false] %s917_s14 }
  0x28   : > { %s919_s16 = scalar_lea.vmem %s918_s14, 128  ;;  %p920_p4 = scmp.lt.s32.totalorder %s1216_s9, %s918_s14 }
  0x29   : > { %805 = vmatmul.mubr.msk.bf16.vlgmr.msra.gmra.mxu0 %vm361_vm1, %v344_v5  ;;  %p915_p1 = pnand %p914_p0, %p1156_p3  ;;  %p921_p5 = scmp.lt.s32.totalorder %s919_s16, %s913_s17 }
  0x2a   : > { %817 = vmatpush3.bf16.msra.mxu0 %v911_v6  ;;  %813 = vmatmul.mubr.msk.bf16.vlgmr.msra.gmra.mxu1 %vm361_vm1, %v344_v5 }
  0x2b   : > { %818 = vmatprep.subr.bf16.mxu0 %v1063_v0  ;;  %820 = vmatprep.mubr.msk.bf16.mxu0 %vm1064_vm0, %v1063_v0  ;;  %p916_p2 = pneg %p915_p1  ;;  %p922_p6 = por %p921_p5, %p920_p4 }
  0x2d   : > { %p923_p7 = pnand %p922_p6, %p916_p2 }
  0x2e   : > { %819 = vmatpush3.bf16.msra.mxu0 %v912_v7 }
  0x31   : > { %821 = vmatmul.mubr.msk.bf16.vlgmr.msra.gmra.mxu0 %vm361_vm1, %v344_v5 }
  0xe9   : > { %v399_v8 = vpop.f32.mrf.mxu0 }
  0xea   : > { %v405_v9 = vpack.c.bf16 %v399_v8, %v399_v8  ;;  %v458_v10 = vpop.f32.mrf.mxu1 }
  0xeb   : > { %v806_v11 = vpop.f32.mrf.mxu0  ;;  %v464_v12 = vpack.c.bf16 %v458_v10, %v458_v10 }
  0xec   : > { %v814_v13 = vpop.f32.mrf.mxu1  ;;  %407 = vst.msk [vmem:[%s309_s7] sm:$0xf] %vm406_vm2, %v405_v9 }
  0xed   : > { %v402_v14 = vpop.f32.mrf.mxu0  ;;  %465 = vst.msk [vmem:[%s316_s12] sm:$0xf] %vm406_vm2, %v464_v12 }
  0xee   : > { %926 = shalt.err (!%p923_p7)
}
  0xef   : > { %s927_s7 = scalar_lea.hbm %s1214_s24, 64  ;;  %s931_s19 = scalar_lea.hbm %s1331_s4, 256 }
  0xf0   : > { %p928_p9 = scmp.ne.s32.totalorder %s1214_s24, %s927_s7  ;;  %p932_p12 = scmp.lt.s32.totalorder %s1214_s24, %s1331_s4 }
  0xf1   : > { %p933_p13 = scmp.lt.s32.totalorder %s931_s19, %s927_s7 }
  0xf2   : > { %p929_p10 = pnand %p928_p9, %p1156_p3 }
  0xf3   : > { %p934_p0 = por %p933_p13, %p932_p12 }
  0xf4   : > { %p930_p11 = pneg %p929_p10 }
  0xf6   : > { %p935_p1 = pnand %p934_p0, %p930_p11 }
  0xf8   : > { %938 = shalt.err (!%p935_p1)
}
  0xf9   : > { %824 = dma.vmem_to_hbm [thread:$0]  (%p1156_p3), %s1216_s9, 64, %s1214_s24, %s525_s8   ;;  %v461_v15 = vpop.f32.mrf.mxu1 }
  0xfa   : > { %s530_s17 = scalar_lea.sflag [#allocation5], %s1204_s18  ;;  %s939_s14 = scalar_lea.vmem %s1224_s13, 64 }
  0xfb   : > { %p940_p2 = scmp.ne.s32.totalorder %s1224_s13, %s939_s14  ;;  %s1066_s0 = smov [#allocation4]  }
  0xfc   : > { %s943_s16 = sshll.u32 %s1066_s0, 4  ;;  %s944_s16 = int_to_ptr.vmem [resolvable:$false] %s943_s16 }
  0xfd   : > { %p941_p4 = pnand %p940_p2, %p1156_p3  ;;  %s945_s7 = scalar_lea.vmem %s944_s16, 128 }
  0xfe   : > { %p946_p6 = scmp.lt.s32.totalorder %s1224_s13, %s944_s16  ;;  %p947_p7 = scmp.lt.s32.totalorder %s945_s7, %s939_s14 }
  0xff   : > { %p942_p5 = pneg %p941_p4 }
 0x100   : > { %p948_p9 = por %p947_p7, %p946_p6 }
 0x102   : > { %p949_p10 = pnand %p948_p9, %p942_p5 }
 0x104   : > { %952 = shalt.err (!%p949_p10)
}
 0x105   : > { %s953_s9 = scalar_lea.hbm %s1222_s29, 64  ;;  %s957_s27 = scalar_lea.hbm %s1332_s5, 256 }
 0x106   : > { %p954_p11 = scmp.ne.s32.totalorder %s1222_s29, %s953_s9  ;;  %p958_p0 = scmp.lt.s32.totalorder %s1222_s29, %s1332_s5 }
 0x107   : > { %p959_p1 = scmp.lt.s32.totalorder %s957_s27, %s953_s9 }
 0x108   : > { %p955_p12 = pnand %p954_p11, %p1156_p3 }
 0x109   : > { %p960_p2 = por %p959_p1, %p958_p0 }
 0x10a   : > { %p956_p13 = pneg %p955_p12 }
 0x10c   : > { %p961_p4 = pnand %p960_p2, %p956_p13 }
 0x10e   : > { %964 = shalt.err (!%p961_p4)
}
 0x10f   : > { %825 = dma.vmem_to_hbm [thread:$0]  (%p1156_p3), %s1224_s13, 64, %s1222_s29, %s530_s17   ;;  %v807_v16 = vpop.f32.mrf.mxu0  ;;  %v815_v17 = vpop.f32.mrf.mxu1 }
 0x110   : > { %s323_s25 = scalar_lea.vmem [#allocation6], %s1199_s30  ;;  %s1276_s7 = scalar_lea.hbm %s1333_s6, %s1206_s20 }
 0x111   : > { %s580_s14 = sshll.u32 %s323_s25, 4  ;;  %v516_v18 = vpop.f32.mrf.mxu0  ;;  %s1067_s30 = smov [#allocation6]   ;;  %s581_s14 = int_to_ptr.vmem [resolvable:$true] %s580_s14 }
 0x112   : > { %v522_v19 = vpack.c.bf16 %v516_v18, %v516_v18  ;;  %s965_s9 = scalar_lea.vmem %s581_s14, 64  ;;  %s969_s13 = sshll.u32 %s1067_s30, 4  ;;  %s970_s13 = int_to_ptr.vmem [resolvable:$false] %s969_s13 }
 0x113   : > { %v822_v20 = vpop.f32.mrf.mxu0  ;;  %p966_p5 = scmp.ne.s32.totalorder %s581_s14, %s965_s9  ;;  %s971_s29 = scalar_lea.vmem %s970_s13, 128 }
 0x114   : > { %523 = vst.msk [vmem:[%s323_s25] sm:$0xf] %vm406_vm2, %v522_v19  ;;  %p972_p9 = scmp.lt.s32.totalorder %s581_s14, %s970_s13  ;;  %p973_p10 = scmp.lt.s32.totalorder %s971_s29, %s965_s9 }
 0x115   : > { %v519_v21 = vpop.f32.mrf.mxu0  ;;  %p967_p6 = pnand %p966_p5, %p1156_p3 }
 0x116   : > { %p974_p11 = por %p973_p10, %p972_p9 }
 0x117   : > { %p968_p7 = pneg %p967_p6 }
 0x119   : > { %p975_p12 = pnand %p974_p11, %p968_p7 }
 0x11b   : > { %978 = shalt.err (!%p975_p12)
}
 0x11c   : > { %s979_s20 = scalar_lea.hbm %s1276_s7, 64  ;;  %s983_s27 = scalar_lea.hbm %s1333_s6, 256 }
 0x11d   : > { %p980_p13 = scmp.ne.s32.totalorder %s1276_s7, %s979_s20  ;;  %p984_p2 = scmp.lt.s32.totalorder %s1276_s7, %s1333_s6 }
 0x11e   : > { %p985_p4 = scmp.lt.s32.totalorder %s983_s27, %s979_s20 }
 0x11f   : > { %p981_p0 = pnand %p980_p13, %p1156_p3 }
 0x120   : > { %p986_p5 = por %p985_p4, %p984_p2 }
 0x121   : > { %p982_p1 = pneg %p981_p0 }
 0x123   : > { %p987_p6 = pnand %p986_p5, %p982_p1 }
 0x125   : > { %990 = shalt.err (!%p987_p6)
}
 0x126   : > { %826 = dma.vmem_to_hbm [thread:$0]  (%p1156_p3), %s581_s14, 64, %s1276_s7, %s530_s17   ;;  %v823_v22 = vpop.f32.mrf.mxu0 }
 0x127 PF: > { %p840_p7 = scmp.ge.s32.totalorder %s1061_s28, 2  ;;  %s592_s25 = sand.u32 1, %s1033_s21  }
 0x128   : > { %s593_s0 = scalar_lea.sflag [#allocation3], %s592_s25 }
 0x129   : > { %p831_p9 = pnand %p840_p7, %p1167_p8 }
 0x12b   : > { %p832_p10 = pneg %p831_p9 }
 0x12d   : > { %1024 = dma.done.wait (%p832_p10), %s593_s0, 64  }
 0x12e   : > { %1026 = vsyncadd (%p832_p10), %s593_s0, 4294967232  ;;  %s1347_s16 = sadd.s32 4294967294, %s1061_s28  }
 0x12f   : > { %s601_s10 = sand.u32 1, %s1347_s16  }
 0x130   : > { %s602_s9 = scalar_lea.sflag [#allocation5], %s601_s10 }
 0x131   : > { %1028 = dma.done.wait (%p832_p10), %s602_s9, 128  }
 0x132   : > { %1030 = vsyncadd (%p832_p10), %s602_s9, 4294967168  ;;  %s23_s28 = sadd.s32 1, %s1061_s28   ;;  %s1348_s25 = sld [smem:[#allocation9_spill]] }
 0x133   : > { %p20_p3 = scmp.ge.s32.totalorder %s23_s28, 6   ;;  %s1349_s11 = sld [smem:[#allocation10_spill]] }
 0x134   : > { %s1350_s27 = sld [smem:[#allocation11_spill]]  ;;  %s1351_s21 = smov %s1037_s22 }
 0x135   : > { %s1352_s22 = smov %s1041_s23  ;;  %s1353_s23 = smov %s1176_s15 }
 0x136   : > { %s1354_s24 = smov %s1053_s26  ;;  %22 = sbr.rel (!%p20_p3) target bundleno = 9 (0x9), region = 112 }
 0x139   : > { %s1355_s26 = smov %s1349_s11 }
 0x13b   :  { %616 = vsyncpa [#allocation3], 1 }
 0x13c   :  { %618 = vsyncpa [#allocation3 + $0x1], 1 }
 0x13d   :  { %619 = vsyncpa [#allocation5], 1 }
 0x13e   :  { %621 = vsyncpa [#allocation5 + $0x1], 1 }

</bundles_post_ra>
